<compile_context>
chip_gen: v6e
topology: v6e:2x2x1
jax: 0.10.0
libtpu: 0.0.40
codegen_flags: <defaults>
</compile_context>

<pallas_src>
import jax
import jax.numpy as jnp
from jax.experimental import pallas as pl
from jax.experimental.pallas import tpu as pltpu

IMG_HEIGHT = 28
IMG_WIDTH = 28
IMG_PIXELS = IMG_HEIGHT * IMG_WIDTH


def _round_up(n, m):
    return ((n + m - 1) // m) * m


def _cdiv(a, b):
    return (a + b - 1) // b


# --------------------------------------------------------------------------
# Kernel
# --------------------------------------------------------------------------
def _encoder_kernel(x_ref, w1_ref, b1_ref, wh_ref, bh_ref, out_ref):
    """One batch tile: fused Linear+ReLU followed by the fused (mu|logvar) head."""
    # x arrives already in the weight compute dtype (bf16 by default); the MXU
    # accumulates in f32 via preferred_element_type.
    h = jnp.dot(x_ref[...], w1_ref[...], preferred_element_type=jnp.float32)
    h = jnp.maximum(h + b1_ref[...], 0.0)                      # bias + ReLU on VPU
    out = jnp.dot(h.astype(wh_ref.dtype), wh_ref[...],
                  preferred_element_type=jnp.float32)
    out_ref[...] = (out + bh_ref[...]).astype(out_ref.dtype)
    # TODO(synk): if fused into a full VAE step, reparameterization
    # (mean + exp(0.5*logvar)*eps via pltpu.prng_random_bits) could be added
    # here; the nn.Module spec only returns (mean, logvar).


# --------------------------------------------------------------------------
# One-time parameter preparation (do NOT call per forward step)
# --------------------------------------------------------------------------
def prepare_encoder_params(params, compute_dtype=jnp.bfloat16):
    """Transpose, fuse the two heads, pad to MXU/lane-friendly shapes.

    Args:
      params: PyTorch nn.Linear convention:
        w1 [H, IMG_PIXELS], b1 [H], w_mu [Z, H], b_mu [Z], w_lv [Z, H], b_lv [Z]
      compute_dtype: dtype for the matmul operands (weights + cast activations).

    Returns:
      dict of padded device arrays + static metadata (python ints).
    """
    H, K = params["w1"].shape
    Z = params["w_mu"].shape[0]
    Hp = _round_up(H, 128)          # e.g. 500 -> 512
    Np = _round_up(2 * Z, 128)      # e.g. 40  -> 128  (do NOT widen further)

    # K stays unpadded (784): full-dim BlockSpec is legal, and 784 is a
    # multiple of 16 (bf16) / 8 (f32) for W1's sublane axis.
    w1_t = params["w1"].T.astype(compute_dtype)                        # [K, H]
    w1_p = jnp.zeros((K, Hp), compute_dtype).at[:, :H].set(w1_t)
    b1_p = jnp.zeros((1, Hp), jnp.float32).at[0, :H].set(
        params["b1"].astype(jnp.float32))

    w_heads = jnp.concatenate(
        [params["w_mu"].T, params["w_lv"].T], axis=1).astype(compute_dtype)  # [H, 2Z]
    wh_p = jnp.zeros((Hp, Np), compute_dtype).at[:H, :2 * Z].set(w_heads)
    b_heads = jnp.concatenate([params["b_mu"], params["b_lv"]]).astype(jnp.float32)
    bh_p = jnp.zeros((1, Np), jnp.float32).at[0, :2 * Z].set(b_heads)

    return {
        "w1": w1_p, "b1": b1_p, "w_heads": wh_p, "b_heads": bh_p,
        "z_dim": Z, "k": K, "h_pad": Hp, "n_pad": Np,
        "compute_dtype": compute_dtype,
    }


# --------------------------------------------------------------------------
# Forward wrapper
# --------------------------------------------------------------------------
def encoder_forward(x, prep, *, batch_tile=None, tb_max=2048):
    """VAE encoder forward: returns (mean, logvar), each [B, z_dim] f32.

    Args:
      x: [B, IMG_PIXELS] float array.
      prep: output of `prepare_encoder_params`.
      batch_tile: rows per grid step (rounded up to a multiple of 16).
        Default: balanced tiles of at most `tb_max` rows, with >= 2 tiles once
        B > 32 so the "parallel" grid axis can feed both v7x TensorCores.
    """
    B, K = x.shape
    assert K == prep["k"], f"expected last dim {prep['k']}, got {K}"
    Hp, Np, Z = prep["h_pad"], prep["n_pad"], prep["z_dim"]
    cdt = prep["compute_dtype"]

    if batch_tile is None:
        if B <= 32:
            TB = _round_up(B, 16)
        else:
            n_tiles = max(2, _cdiv(B, tb_max))            # >=2 tiles (megacore)
            TB = min(tb_max, _round_up(_cdiv(B, n_tiles), 16))  # balanced
    else:
        TB = _round_up(batch_tile, 16)
    Bp = _round_up(B, TB)

    # Cast x to the compute dtype in the wrapper (halves x HBM bytes for bf16)
    # and pad ONLY the batch axis when needed; padded zero rows are sliced off.
    x_p = x.astype(cdt)
    if Bp != B:
        x_p = jnp.pad(x_p, ((0, Bp - B), (0, 0)))

    out = pl.pallas_call(
        _encoder_kernel,
        out_shape=jax.ShapeDtypeStruct((Bp, Np), jnp.float32),
        grid_spec=pltpu.PrefetchScalarGridSpec(
            num_scalar_prefetch=0,
            grid=(Bp // TB,),
            in_specs=[
                pl.BlockSpec((TB, K), lambda i: (i, 0)),    # x tile (pipelined)
                pl.BlockSpec((K, Hp), lambda i: (0, 0)),    # W1      (resident)
                pl.BlockSpec((1, Hp), lambda i: (0, 0)),    # b1      (resident)
                pl.BlockSpec((Hp, Np), lambda i: (0, 0)),   # W_heads (resident)
                pl.BlockSpec((1, Np), lambda i: (0, 0)),    # b_heads (resident)
            ],
            out_specs=pl.BlockSpec((TB, Np), lambda i: (i, 0)),
        ),
        compiler_params=pltpu.CompilerParams(
            dimension_semantics=("parallel",),
            vmem_limit_bytes=64 * 1024 * 1024),
    )(x_p, prep["w1"], prep["b1"], prep["w_heads"], prep["b_heads"])

    mean = out[:B, :Z]
    logvar = out[:B, Z:2 * Z]
    return mean, logvar


# --------------------------------------------------------------------------
# Reference + test harness
# --------------------------------------------------------------------------
def _init_params(key, hidden_dim, z_dim):
    """Deterministic synthetic init with PyTorch nn.Linear shapes."""
    ks = jax.random.split(key, 6)
    s1 = 1.0 / jnp.sqrt(IMG_PIXELS)
    s2 = 1.0 / jnp.sqrt(hidden_dim)
    return {
        "w1":   jax.random.uniform(ks[0], (hidden_dim, IMG_PIXELS),
                                   jnp.float32, -s1, s1),
        "b1":   jax.random.uniform(ks[1], (hidden_dim,), jnp.float32, -s1, s1),
        "w_mu": jax.random.uniform(ks[2], (z_dim, hidden_dim),
                                   jnp.float32, -s2, s2),
        "b_mu": jax.random.uniform(ks[3], (z_dim,), jnp.float32, -s2, s2),
        "w_lv": jax.random.uniform(ks[4], (z_dim, hidden_dim),
                                   jnp.float32, -s2, s2),
        "b_lv": jax.random.uniform(ks[5], (z_dim,), jnp.float32, -s2, s2),
    }


def _reference(x, params):
    h = jnp.maximum(x @ params["w1"].T + params["b1"], 0.0)
    mean = h @ params["w_mu"].T + params["b_mu"]
    logvar = h @ params["w_lv"].T + params["b_lv"]
    return mean, logvar


def _run_case(key, B, hidden, z_dim, compute_dtype, batch_tile, atol):
    k_x, k_p = jax.random.split(key)
    x = jax.random.normal(k_x, (B, IMG_PIXELS), dtype=jnp.float32)
    params = _init_params(k_p, hidden, z_dim)

    prep = prepare_encoder_params(params, compute_dtype=compute_dtype)
    mean, logvar = encoder_forward(x, prep, batch_tile=batch_tile)
    jax.block_until_ready((mean, logvar))

    ref_mean, ref_logvar = _reference(x, params)
    assert mean.shape == (B, z_dim) and logvar.shape == (B, z_dim)
    assert jnp.allclose(mean, ref_mean, atol=atol, rtol=atol), (
        f"mean mismatch, max err {jnp.max(jnp.abs(mean - ref_mean))}")
    assert jnp.allclose(logvar, ref_logvar, atol=atol, rtol=atol), (
        f"logvar mismatch, max err {jnp.max(jnp.abs(logvar - ref_logvar))}")


if __name__ == "__main__":
    key = jax.random.PRNGKey(0)
    k1, k2, k3 = jax.random.split(key, 3)

    # Case 1: module-default dims (hidden=500, z=20), tiny batch -> single
    # 16-row grid step, bf16 weights+activations (loose tol vs f32 reference).
    _run_case(k1, B=8, hidden=500, z_dim=20,
              compute_dtype=jnp.bfloat16, batch_tile=None, atol=3e-2)

    # Case 2: multi-step batch grid with resident weights and batch padding
    # (B=50, tile=16 -> grid=(4,), padded to 64), f32 compute (tight tol).
    _run_case(k2, B=50, hidden=500, z_dim=20,
              compute_dtype=jnp.float32, batch_tile=16, atol=2e-3)

    # Case 3: default auto-tiling path for B>32 (balanced >=2 tiles, bf16 x).
    _run_case(k3, B=130, hidden=500, z_dim=20,
              compute_dtype=jnp.bfloat16, batch_tile=None, atol=3e-2)

    print("KERNEL_OK")
</pallas_src>

<mosaic_0001>
module attributes {stable_mosaic.version = 11 : i64} {
  func.func @_encoder_kernel(%arg0: i32, %arg1: memref<16x784xbf16, #tpu.memory_space<vmem>>, %arg2: memref<784x512xbf16, #tpu.memory_space<vmem>>, %arg3: memref<1x512xf32, #tpu.memory_space<vmem>>, %arg4: memref<512x128xbf16, #tpu.memory_space<vmem>>, %arg5: memref<1x128xf32, #tpu.memory_space<vmem>>, %arg6: memref<16x128xf32, #tpu.memory_space<vmem>>) attributes {dimension_semantics = [#tpu.dimension_semantics<parallel>], iteration_bounds = array<i64: 1>, scalar_prefetch = 0 : i64, scratch_operands = 0 : i64, tpu.core_type = #tpu.core_type<tc>, window_params = [{transform_indices = @transform_0, window_bounds = array<i64: 16, 784>}, {pipeline_mode = #tpu.pipeline_mode<synchronous>, transform_indices = @transform_1, window_bounds = array<i64: 784, 512>}, {pipeline_mode = #tpu.pipeline_mode<synchronous>, transform_indices = @transform_2, window_bounds = array<i64: 1, 512>}, {pipeline_mode = #tpu.pipeline_mode<synchronous>, transform_indices = @transform_3, window_bounds = array<i64: 512, 128>}, {pipeline_mode = #tpu.pipeline_mode<synchronous>, transform_indices = @transform_4, window_bounds = array<i64: 1, 128>}, {transform_indices = @transform_5, window_bounds = array<i64: 16, 128>}]} {
    %c0 = arith.constant 0 : index
    %c0_0 = arith.constant 0 : index
    %0 = vector.load %arg1[%c0, %c0_0] : memref<16x784xbf16, #tpu.memory_space<vmem>>, vector<16x784xbf16>
    %c0_1 = arith.constant 0 : index
    %c0_2 = arith.constant 0 : index
    %1 = vector.load %arg2[%c0_1, %c0_2] : memref<784x512xbf16, #tpu.memory_space<vmem>>, vector<784x512xbf16>
    %cst = arith.constant dense<0.000000e+00> : vector<16x512xf32>
    %2 = tpu.matmul %0, %1, %cst {dimension_numbers = #tpu.dot_dimension_numbers<[1], [0], [0], [1], [0, 0, 1, 1], [], []>} : vector<16x784xbf16>, vector<784x512xbf16>, vector<16x512xf32> -> vector<16x512xf32>
    %c0_3 = arith.constant 0 : index
    %c0_4 = arith.constant 0 : index
    %3 = vector.load %arg3[%c0_3, %c0_4] : memref<1x512xf32, #tpu.memory_space<vmem>>, vector<1x512xf32>
    %4 = vector.broadcast %3 : vector<1x512xf32> to vector<16x512xf32>
    %5 = arith.addf %2, %4 : vector<16x512xf32>
    %cst_5 = arith.constant 0.000000e+00 : f32
    %6 = vector.broadcast %cst_5 : f32 to vector<16x512xf32>
    %7 = arith.maximumf %5, %6 : vector<16x512xf32>
    %8 = arith.truncf %7 : vector<16x512xf32> to vector<16x512xbf16>
    %c0_6 = arith.constant 0 : index
    %c0_7 = arith.constant 0 : index
    %9 = vector.load %arg4[%c0_6, %c0_7] : memref<512x128xbf16, #tpu.memory_space<vmem>>, vector<512x128xbf16>
    %cst_8 = arith.constant dense<0.000000e+00> : vector<16x128xf32>
    %10 = tpu.matmul %8, %9, %cst_8 {dimension_numbers = #tpu.dot_dimension_numbers<[1], [0], [0], [1], [0, 0, 1, 1], [], []>} : vector<16x512xbf16>, vector<512x128xbf16>, vector<16x128xf32> -> vector<16x128xf32>
    %c0_9 = arith.constant 0 : index
    %c0_10 = arith.constant 0 : index
    %11 = vector.load %arg5[%c0_9, %c0_10] : memref<1x128xf32, #tpu.memory_space<vmem>>, vector<1x128xf32>
    %12 = vector.broadcast %11 : vector<1x128xf32> to vector<16x128xf32>
    %13 = arith.addf %10, %12 : vector<16x128xf32>
    %c0_11 = arith.constant 0 : index
    %c0_12 = arith.constant 0 : index
    %14 = vector.load %arg6[%c0_11, %c0_12] : memref<16x128xf32, #tpu.memory_space<vmem>>, vector<16x128xf32>
    tpu.vector_store %arg6[%c0_11, %c0_12], %13 {strides = array<i32>} : memref<16x128xf32, #tpu.memory_space<vmem>>, vector<16x128xf32>,
    return
  }
  func.func @transform_0(%arg0: i32) -> (i32, i32) {
    %c0_i32 = arith.constant 0 : i32
    %c0_i32_0 = arith.constant 0 : i32
    return %arg0, %c0_i32 : i32, i32
  }
  func.func @transform_1(%arg0: i32) -> (i32, i32) {
    %c0_i32 = arith.constant 0 : i32
    %c0_i32_0 = arith.constant 0 : i32
    %c0_i32_1 = arith.constant 0 : i32
    return %c0_i32, %c0_i32_0 : i32, i32
  }
  func.func @transform_2(%arg0: i32) -> (i32, i32) {
    %c0_i32 = arith.constant 0 : i32
    %c0_i32_0 = arith.constant 0 : i32
    %c0_i32_1 = arith.constant 0 : i32
    return %c0_i32, %c0_i32_0 : i32, i32
  }
  func.func @transform_3(%arg0: i32) -> (i32, i32) {
    %c0_i32 = arith.constant 0 : i32
    %c0_i32_0 = arith.constant 0 : i32
    %c0_i32_1 = arith.constant 0 : i32
    return %c0_i32, %c0_i32_0 : i32, i32
  }
  func.func @transform_4(%arg0: i32) -> (i32, i32) {
    %c0_i32 = arith.constant 0 : i32
    %c0_i32_0 = arith.constant 0 : i32
    %c0_i32_1 = arith.constant 0 : i32
    return %c0_i32, %c0_i32_0 : i32, i32
  }
  func.func @transform_5(%arg0: i32) -> (i32, i32) {
    %c0_i32 = arith.constant 0 : i32
    %c0_i32_0 = arith.constant 0 : i32
    return %arg0, %c0_i32 : i32, i32
  }
}

</mosaic_0001>

<bundles_post_ra>
// kernel: tpu_custom_call.1
= control target key start
LH: loop header
LB: loop body
LE: loop exit
PB: predicated region body
PF: predicated region fallthrough
CT: control target
= control target key end

     0   :  { %10 = vsyncpa [#allocation3], 0  ;;  %s2876_s0 = inlined_call_operand.hbm [shape: bf16[16,784], index: 0, kind: input, shape index: {}]   ;;  %s2877_s1 = inlined_call_operand.hbm [shape: bf16[784,512], index: 1, kind: input, shape index: {}]   ;;  %s2878_s2 = inlined_call_operand.hbm [shape: f32[1,512], index: 2, kind: input, shape index: {}]   ;;  %s2879_s3 = inlined_call_operand.hbm [shape: bf16[512,128], index: 3, kind: input, shape index: {}]   ;;  %s2880_s4 = inlined_call_operand.vmem [shape: f32[1,128], index: 4, kind: input, shape index: {}]   ;;  %s2881_s5 = inlined_call_operand.hbm [shape: f32[16,128], index: 5, kind: output, shape index: {}]  }
   0x1   :  { %11 = vsyncpa [#allocation6], 0 }
   0x2   :  { %12 = vsyncpa [#allocation9], 0 }
   0x3   :  { %13 = vsyncpa [#allocation4], 0  ;;  %s2782_s18 = smov [#allocation5]  }
   0x4   :  { %s31_s19 = sshll.u32 %s2782_s18, 4  ;;  %s32_s19 = int_to_ptr.vmem [resolvable:$true] %s31_s19 }
   0x5   :  { %s2682_s20 = scalar_lea.vmem %s32_s19, 25088  ;;  %p2687_p1 = scmp.lt.s32.totalorder %s32_s19, %s32_s19 }
   0x6   :  { %p2683_p0 = scmp.ne.s32.totalorder %s32_s19, %s2682_s20  ;;  %p2688_p2 = scmp.lt.s32.totalorder %s2682_s20, %s2682_s20 }
   0x8   :  { %p2689_p3 = por %p2688_p2, %p2687_p1 }
   0xa   :  { %p2690_p4 = pnand %p2689_p3, %p2683_p0 }
   0xc   :  { %2693 = shalt.err (!%p2690_p4)
}
   0xd   :  { %s2783_s21 = smov 256   ;;  %s2784_s22 = smov 16  }
   0xe   :  { %37 = dma.hbm_to_vmem [thread:$0]  %s2877_s1, 25088, %s32_s19, [#allocation6], %s2783_s21, %s2783_s21, %s2784_s22  }
   0xf   :  { %s2785_s25 = smov [#allocation2]  }
  0x10   :  { %s19_s26 = sshll.u32 %s2785_s25, 4  ;;  %s20_s26 = int_to_ptr.vmem [resolvable:$true] %s19_s26 }
  0x11   :  { %s2702_s27 = scalar_lea.vmem %s20_s26, 896  ;;  %p2707_p6 = scmp.lt.s32.totalorder %s20_s26, %s20_s26 }
  0x12   :  { %p2703_p5 = scmp.ne.s32.totalorder %s20_s26, %s2702_s27  ;;  %p2708_p7 = scmp.lt.s32.totalorder %s2702_s27, %s2702_s27 }
  0x14   :  { %p2709_p8 = por %p2708_p7, %p2707_p6 }
  0x16   :  { %p2710_p9 = pnand %p2709_p8, %p2703_p5 }
  0x18   :  { %2713 = shalt.err (!%p2710_p9)
}
  0x19   :  { %s2786_s28 = smov 448   ;;  %s2787_s29 = smov 28  }
  0x1a   :  { %25 = dma.hbm_to_vmem [thread:$0]  %s2876_s0, 896, %s20_s26, [#allocation3], %s2786_s28, %s2786_s28, %s2787_s29  }
  0x1b   :  { %s2788_s7 = smov [#allocation7]   ;;  %s2789_s9 = smov [#allocation8]  }
  0x1c   :  { %s44_s8 = sshll.u32 %s2788_s7, 4  ;;  %s53_s1 = sshll.u32 %s2789_s9, 4  ;;  %s45_s8 = int_to_ptr.vmem [resolvable:$true] %s44_s8  ;;  %s54_s1 = int_to_ptr.vmem [resolvable:$true] %s53_s1 }
  0x1d   :  { %s2722_s10 = scalar_lea.vmem %s45_s8, 64  ;;  %p2727_p11 = scmp.lt.s32.totalorder %s45_s8, %s45_s8 }
  0x1e   :  { %p2723_p10 = scmp.ne.s32.totalorder %s45_s8, %s2722_s10  ;;  %p2728_p12 = scmp.lt.s32.totalorder %s2722_s10, %s2722_s10 }
  0x20   :  { %p2729_p13 = por %p2728_p12, %p2727_p11 }
  0x22   :  { %p2730_p0 = pnand %p2729_p13, %p2723_p10 }
  0x24   :  { %2733 = shalt.err (!%p2730_p0)
}
  0x25   :  { %47 = dma.hbm_to_vmem [thread:$0]  %s2878_s2, 64, %s45_s8, [#allocation6]  }
  0x26   :  { %s2742_s13 = scalar_lea.vmem %s54_s1, 4096  ;;  %p2747_p2 = scmp.lt.s32.totalorder %s54_s1, %s54_s1 }
  0x27   :  { %p2743_p1 = scmp.ne.s32.totalorder %s54_s1, %s2742_s13  ;;  %p2748_p3 = scmp.lt.s32.totalorder %s2742_s13, %s2742_s13 }
  0x29   :  { %p2749_p4 = por %p2748_p3, %p2747_p2 }
  0x2b   :  { %p2750_p5 = pnand %p2749_p4, %p2743_p1 }
  0x2d   :  { %2753 = shalt.err (!%p2750_p5)
}
  0x2e   :  { %s2790_s0 = smov 64   ;;  %s2791_s14 = smov 4  }
  0x2f   :  { %59 = dma.hbm_to_vmem [thread:$0]  %s2879_s3, 4096, %s54_s1, [#allocation9], %s2790_s0, %s2790_s0, %s2791_s14  }
  0x30   :  { %2774 = dma.done.wait [#allocation3], 896  }
  0x31   :  { %2775 = vsyncadd [#allocation3], 4294966400 }
  0x32   :  { %2776 = dma.done.wait [#allocation6], 25152  }
  0x33   :  { %2777 = vsyncadd [#allocation6], 4294942144 }
  0x34   :  { %2778 = dma.done.wait [#allocation9], 4096  }
  0x35   :  { %2779 = vsyncadd [#allocation9], 4294963200  ;;  %v2338_v0 = vld [vmem:[#allocation5 + $0xe4] ss:$16 sps:$4 sm:$0xff]   ;;  %v2342_v2 = vld [vmem:[#allocation5 + $0xe0] ss:$16 sps:$4 sm:$0xff]  }
  0x36   :  { %v2340_v1 = vld [vmem:[#allocation5 + $0x2e4] ss:$16 sps:$4 sm:$0xff]   ;;  %1320 = vmatprep.subr.bf16.mxu0 %v2338_v0  ;;  %v2343_v3 = vld [vmem:[#allocation5 + $0x2e0] ss:$16 sps:$4 sm:$0xff]   ;;  %v2838_v49 = vld [vmem:[#allocation2 + $0x4] ss:$28 sps:$4 sm:$0xff]  }
  0x37   :  { %1363 = vmatprep.subr.bf16.mxu1 %v2340_v1  ;;  %v2344_v4 = vld [vmem:[#allocation5 + $0xc4] ss:$16 sps:$4 sm:$0xff]   ;;  %1321 = vmatpush1.bf16.msra.mxu0 %v2342_v2  ;;  %v2348_v6 = vld [vmem:[#allocation5 + $0xc0] ss:$16 sps:$4 sm:$0xff]   ;;  %vm1316_vm0 = vcmask 130048   ;;  %s2793_s17 = smov [#allocation10]  }
  0x38   :  { %1364 = vmatpush1.bf16.msra.mxu1 %v2343_v3  ;;  %v2346_v5 = vld [vmem:[#allocation5 + $0x2c4] ss:$16 sps:$4 sm:$0xff]   ;;  %1322 = vmatprep.subr.bf16.mxu0 %v2344_v4  ;;  %v2349_v7 = vld [vmem:[#allocation5 + $0x2c0] ss:$16 sps:$4 sm:$0xff]   ;;  %s2028_s18 = sshll.u32 %s2793_s17, 4  ;;  %s2029_s18 = int_to_ptr.vmem [resolvable:$true] %s2028_s18 }
  0x39   :  { %1365 = vmatprep.subr.bf16.mxu1 %v2346_v5  ;;  %v2350_v8 = vld [vmem:[#allocation5 + $0xa4] ss:$16 sps:$4 sm:$0xff]   ;;  %v2354_v10 = vld [vmem:[#allocation5 + $0xa0] ss:$16 sps:$4 sm:$0xff]   ;;  %1352 = vmatprep.mubr.bf16.mxu0 %v2838_v49  ;;  %s2754_s19 = scalar_lea.vmem %s2029_s18, 256  ;;  %p2759_p7 = scmp.lt.s32.totalorder %s2029_s18, %s2029_s18 }
  0x3a   :  { %v2352_v9 = vld [vmem:[#allocation5 + $0x2a4] ss:$16 sps:$4 sm:$0xff]   ;;  %v2355_v11 = vld [vmem:[#allocation5 + $0x2a0] ss:$16 sps:$4 sm:$0xff]   ;;  %p2755_p6 = scmp.ne.s32.totalorder %s2029_s18, %s2754_s19  ;;  %p2760_p8 = scmp.lt.s32.totalorder %s2754_s19, %s2754_s19 }
  0x3b   :  { %1323 = vmatpush1.bf16.msra.mxu0 %v2348_v6  ;;  %v2356_v12 = vld [vmem:[#allocation5 + $0x84] ss:$16 sps:$4 sm:$0xff]   ;;  %v2360_v14 = vld [vmem:[#allocation5 + $0x80] ss:$16 sps:$4 sm:$0xff]  }
  0x3c   :  { %1366 = vmatpush1.bf16.msra.mxu1 %v2349_v7  ;;  %1324 = vmatprep.subr.bf16.mxu0 %v2350_v8  ;;  %v2358_v13 = vld [vmem:[#allocation5 + $0x284] ss:$16 sps:$4 sm:$0xff]   ;;  %v2361_v15 = vld [vmem:[#allocation5 + $0x280] ss:$16 sps:$4 sm:$0xff]   ;;  %p2761_p9 = por %p2760_p8, %p2759_p7 }
  0x3d   :  { %1367 = vmatprep.subr.bf16.mxu1 %v2352_v9  ;;  %v2362_v16 = vld [vmem:[#allocation5 + $0x64] ss:$16 sps:$4 sm:$0xff]   ;;  %v2366_v18 = vld [vmem:[#allocation5 + $0x60] ss:$16 sps:$4 sm:$0xff]   ;;  %v2451_v9 = vld [vmem:[#allocation5 + $0xec] ss:$16 sps:$4 sm:$0xff]  }
  0x3e   :  { %v2364_v17 = vld [vmem:[#allocation5 + $0x264] ss:$16 sps:$4 sm:$0xff]   ;;  %v2367_v19 = vld [vmem:[#allocation5 + $0x260] ss:$16 sps:$4 sm:$0xff]   ;;  %p2762_p10 = pnand %p2761_p9, %p2755_p6 }
  0x3f   :  { %1325 = vmatpush1.bf16.msra.mxu0 %v2354_v10  ;;  %v2368_v20 = vld [vmem:[#allocation5 + $0x44] ss:$16 sps:$4 sm:$0xff]   ;;  %v2372_v22 = vld [vmem:[#allocation5 + $0x40] ss:$16 sps:$4 sm:$0xff]  }
  0x40   :  { %1368 = vmatpush1.bf16.msra.mxu1 %v2355_v11  ;;  %1326 = vmatprep.subr.bf16.mxu0 %v2356_v12  ;;  %v2370_v21 = vld [vmem:[#allocation5 + $0x244] ss:$16 sps:$4 sm:$0xff]   ;;  %v2373_v23 = vld [vmem:[#allocation5 + $0x240] ss:$16 sps:$4 sm:$0xff]   ;;  %v2792_v11 = vmov 0  }
  0x41   :  { %1369 = vmatprep.subr.bf16.mxu1 %v2358_v13  ;;  %v2374_v24 = vld [vmem:[#allocation5 + $0x24] ss:$16 sps:$4 sm:$0xff]   ;;  %v2378_v26 = vld [vmem:[#allocation5 + $0x20] ss:$16 sps:$4 sm:$0xff]   ;;  %v2449_v13 = vld [vmem:[#allocation5 + $0xe8] ss:$16 sps:$4 sm:$0xff]  }
  0x42   :  { %v2376_v25 = vld [vmem:[#allocation5 + $0x224] ss:$16 sps:$4 sm:$0xff]   ;;  %v2379_v27 = vld [vmem:[#allocation5 + $0x220] ss:$16 sps:$4 sm:$0xff]  }
  0x43   :  { %1327 = vmatpush1.bf16.msra.mxu0 %v2360_v14  ;;  %v2380_v28 = vld [vmem:[#allocation5 + $0x4] ss:$16 sps:$4 sm:$0xff]   ;;  %v2384_v30 = vld [vmem:[#allocation5] ss:$16 sps:$4 sm:$0xff]  }
  0x44   :  { %1370 = vmatpush1.bf16.msra.mxu1 %v2361_v15  ;;  %1328 = vmatprep.subr.bf16.mxu0 %v2362_v16  ;;  %v2382_v29 = vld [vmem:[#allocation5 + $0x204] ss:$16 sps:$4 sm:$0xff]   ;;  %v2385_v31 = vld [vmem:[#allocation5 + $0x200] ss:$16 sps:$4 sm:$0xff]   ;;  %v2458_v16 = vld [vmem:[#allocation5 + $0xcc] ss:$16 sps:$4 sm:$0xff]  }
  0x45   :  { %1371 = vmatprep.subr.bf16.mxu1 %v2364_v17  ;;  %v2386_v32 = vld [vmem:[#allocation5 + $0x1e4] ss:$16 sps:$4 sm:$0xff]   ;;  %v2390_v34 = vld [vmem:[#allocation5 + $0x1e0] ss:$16 sps:$4 sm:$0xff]  }
  0x46   :  { %v2388_v33 = vld [vmem:[#allocation5 + $0x3e4] ss:$16 sps:$4 sm:$0xff]   ;;  %v2391_v35 = vld [vmem:[#allocation5 + $0x3e0] ss:$16 sps:$4 sm:$0xff]  }
  0x47   :  { %1329 = vmatpush1.bf16.msra.mxu0 %v2366_v18  ;;  %v2392_v36 = vld [vmem:[#allocation5 + $0x1c4] ss:$16 sps:$4 sm:$0xff]   ;;  %v2396_v38 = vld [vmem:[#allocation5 + $0x1c0] ss:$16 sps:$4 sm:$0xff]   ;;  %v2456_v18 = vld [vmem:[#allocation5 + $0xc8] ss:$16 sps:$4 sm:$0xff]  }
  0x48   :  { %1372 = vmatpush1.bf16.msra.mxu1 %v2367_v19  ;;  %1330 = vmatprep.subr.bf16.mxu0 %v2368_v20  ;;  %v2394_v37 = vld [vmem:[#allocation5 + $0x3c4] ss:$16 sps:$4 sm:$0xff]   ;;  %v2397_v39 = vld [vmem:[#allocation5 + $0x3c0] ss:$16 sps:$4 sm:$0xff]   ;;  %v2464_v20 = vld [vmem:[#allocation5 + $0xac] ss:$16 sps:$4 sm:$0xff]  }
  0x49   :  { %1373 = vmatprep.subr.bf16.mxu1 %v2370_v21  ;;  %v2398_v40 = vld [vmem:[#allocation5 + $0x1a4] ss:$16 sps:$4 sm:$0xff]   ;;  %v2402_v42 = vld [vmem:[#allocation5 + $0x1a0] ss:$16 sps:$4 sm:$0xff]  }
  0x4a   :  { %v2400_v41 = vld [vmem:[#allocation5 + $0x3a4] ss:$16 sps:$4 sm:$0xff]   ;;  %v2403_v43 = vld [vmem:[#allocation5 + $0x3a0] ss:$16 sps:$4 sm:$0xff]  }
  0x4b   :  { %1331 = vmatpush1.bf16.msra.mxu0 %v2372_v22  ;;  %v2404_v44 = vld [vmem:[#allocation5 + $0x184] ss:$16 sps:$4 sm:$0xff]   ;;  %v2408_v46 = vld [vmem:[#allocation5 + $0x180] ss:$16 sps:$4 sm:$0xff]   ;;  %v2462_v22 = vld [vmem:[#allocation5 + $0xa8] ss:$16 sps:$4 sm:$0xff]  }
  0x4c   :  { %1374 = vmatpush1.bf16.msra.mxu1 %v2373_v23  ;;  %1332 = vmatprep.subr.bf16.mxu0 %v2374_v24  ;;  %v2406_v45 = vld [vmem:[#allocation5 + $0x384] ss:$16 sps:$4 sm:$0xff]   ;;  %v2409_v47 = vld [vmem:[#allocation5 + $0x380] ss:$16 sps:$4 sm:$0xff]   ;;  %v2470_v24 = vld [vmem:[#allocation5 + $0x8c] ss:$16 sps:$4 sm:$0xff]  }
  0x4d   :  { %1375 = vmatprep.subr.bf16.mxu1 %v2376_v25  ;;  %v2410_v48 = vld [vmem:[#allocation5 + $0x164] ss:$16 sps:$4 sm:$0xff]   ;;  %v2414_v52 = vld [vmem:[#allocation5 + $0x160] ss:$16 sps:$4 sm:$0xff]  }
  0x4e   :  { %v2412_v50 = vld [vmem:[#allocation5 + $0x364] ss:$16 sps:$4 sm:$0xff]   ;;  %v2415_v53 = vld [vmem:[#allocation5 + $0x360] ss:$16 sps:$4 sm:$0xff]  }
  0x4f   :  { %1333 = vmatpush1.bf16.msra.mxu0 %v2378_v26  ;;  %v2840_v51 = vld [vmem:[#allocation2 + $0xc] ss:$28 sps:$4 sm:$0xff]   ;;  %v2844_v4 = vld [vmem:[#allocation2] ss:$28 sps:$4 sm:$0xff]   ;;  %v2851_v14 = vld [vmem:[#allocation2 + $0x18] ss:$28 sps:$4 sm:$0xff]  }
  0x50   :  { %1376 = vmatpush1.bf16.msra.mxu1 %v2379_v27  ;;  %1334 = vmatprep.subr.bf16.mxu0 %v2380_v28  ;;  %v2416_v54 = vld [vmem:[#allocation5 + $0x144] ss:$16 sps:$4 sm:$0xff]   ;;  %v2420_v56 = vld [vmem:[#allocation5 + $0x140] ss:$16 sps:$4 sm:$0xff]   ;;  %v2468_v26 = vld [vmem:[#allocation5 + $0x88] ss:$16 sps:$4 sm:$0xff]  }
  0x51   :  { %1377 = vmatprep.subr.bf16.mxu1 %v2382_v29  ;;  %1395 = vmatprep.mubr.bf16.mxu1 %v2840_v51  ;;  %v2418_v55 = vld [vmem:[#allocation5 + $0x344] ss:$16 sps:$4 sm:$0xff]   ;;  %v2421_v57 = vld [vmem:[#allocation5 + $0x340] ss:$16 sps:$4 sm:$0xff]   ;;  %v2476_v28 = vld [vmem:[#allocation5 + $0x6c] ss:$16 sps:$4 sm:$0xff]  }
  0x52   :  { %v2422_v58 = vld [vmem:[#allocation5 + $0x124] ss:$16 sps:$4 sm:$0xff]   ;;  %v2426_v60 = vld [vmem:[#allocation5 + $0x120] ss:$16 sps:$4 sm:$0xff]  }
  0x53   :  { %1335 = vmatpush1.bf16.msra.mxu0 %v2384_v30  ;;  %v2424_v59 = vld [vmem:[#allocation5 + $0x324] ss:$16 sps:$4 sm:$0xff]   ;;  %v2427_v61 = vld [vmem:[#allocation5 + $0x320] ss:$16 sps:$4 sm:$0xff]   ;;  %v2474_v30 = vld [vmem:[#allocation5 + $0x68] ss:$16 sps:$4 sm:$0xff]  }
  0x54   :  { %1378 = vmatpush1.bf16.msra.mxu1 %v2385_v31  ;;  %1336 = vmatprep.subr.bf16.mxu0 %v2386_v32  ;;  %v2428_v62 = vld [vmem:[#allocation5 + $0x104] ss:$16 sps:$4 sm:$0xff]   ;;  %v2432_v0 = vld [vmem:[#allocation5 + $0x100] ss:$16 sps:$4 sm:$0xff]   ;;  %v2482_v32 = vld [vmem:[#allocation5 + $0x4c] ss:$16 sps:$4 sm:$0xff]  }
  0x55   :  { %1379 = vmatprep.subr.bf16.mxu1 %v2388_v33  ;;  %v2430_v63 = vld [vmem:[#allocation5 + $0x304] ss:$16 sps:$4 sm:$0xff]   ;;  %v2433_v1 = vld [vmem:[#allocation5 + $0x300] ss:$16 sps:$4 sm:$0xff]   ;;  %v2856_v33 = vld [vmem:[#allocation2 + $0x14] ss:$28 sps:$4 sm:$0xff]  }
  0x56   :  { %v2442_v2 = vld [vmem:[#allocation5 + $0x4e4] ss:$16 sps:$4 sm:$0xff]   ;;  %v2846_v5 = vld [vmem:[#allocation2 + $0x8] ss:$28 sps:$4 sm:$0xff]  }
  0x57   :  { %1337 = vmatpush2.bf16.msra.mxu0 %v2390_v34  ;;  %v2445_v3 = vld [vmem:[#allocation5 + $0x604] ss:$16 sps:$4 sm:$0xff]   ;;  %v2440_v6 = vld [vmem:[#allocation5 + $0x4e0] ss:$16 sps:$4 sm:$0xff]  }
  0x58   :  { %1380 = vmatpush2.bf16.msra.mxu1 %v2391_v35  ;;  %1338 = vmatprep.subr.bf16.mxu0 %v2392_v36  ;;  %v2443_v7 = vld [vmem:[#allocation5 + $0x600] ss:$16 sps:$4 sm:$0xff]   ;;  %v2448_v8 = vld [vmem:[#allocation5 + $0x4c4] ss:$16 sps:$4 sm:$0xff]   ;;  %v2480_v35 = vld [vmem:[#allocation5 + $0x48] ss:$16 sps:$4 sm:$0xff]  }
  0x59   :  { %1381 = vmatprep.subr.bf16.mxu1 %v2394_v37  ;;  %v2446_v10 = vld [vmem:[#allocation5 + $0x4c0] ss:$16 sps:$4 sm:$0xff]   ;;  %v2454_v12 = vld [vmem:[#allocation5 + $0x4a4] ss:$16 sps:$4 sm:$0xff]   ;;  %v2488_v37 = vld [vmem:[#allocation5 + $0x2c] ss:$16 sps:$4 sm:$0xff]  }
  0x5a   :  { %v2452_v15 = vld [vmem:[#allocation5 + $0x4a0] ss:$16 sps:$4 sm:$0xff]   ;;  %v2461_v17 = vld [vmem:[#allocation5 + $0x484] ss:$16 sps:$4 sm:$0xff]  }
  0x5b   :  { %1339 = vmatpush2.bf16.msra.mxu0 %v2396_v38  ;;  %v2459_v19 = vld [vmem:[#allocation5 + $0x480] ss:$16 sps:$4 sm:$0xff]   ;;  %v2467_v21 = vld [vmem:[#allocation5 + $0x464] ss:$16 sps:$4 sm:$0xff]  }
  0x5c   :  { %1382 = vmatpush2.bf16.msra.mxu1 %v2397_v39  ;;  %1340 = vmatprep.subr.bf16.mxu0 %v2398_v40  ;;  %v2465_v23 = vld [vmem:[#allocation5 + $0x460] ss:$16 sps:$4 sm:$0xff]   ;;  %v2473_v25 = vld [vmem:[#allocation5 + $0x444] ss:$16 sps:$4 sm:$0xff]   ;;  %v2486_v39 = vld [vmem:[#allocation5 + $0x28] ss:$16 sps:$4 sm:$0xff]  }
  0x5d   :  { %1383 = vmatprep.subr.bf16.mxu1 %v2400_v41  ;;  %v2471_v27 = vld [vmem:[#allocation5 + $0x440] ss:$16 sps:$4 sm:$0xff]   ;;  %v2479_v29 = vld [vmem:[#allocation5 + $0x424] ss:$16 sps:$4 sm:$0xff]   ;;  %v2494_v41 = vld [vmem:[#allocation5 + $0xc] ss:$16 sps:$4 sm:$0xff]  }
  0x5e   :  { %v2477_v31 = vld [vmem:[#allocation5 + $0x420] ss:$16 sps:$4 sm:$0xff]   ;;  %v2485_v34 = vld [vmem:[#allocation5 + $0x404] ss:$16 sps:$4 sm:$0xff]  }
  0x5f   :  { %1341 = vmatpush2.bf16.msra.mxu0 %v2402_v42  ;;  %v2483_v36 = vld [vmem:[#allocation5 + $0x400] ss:$16 sps:$4 sm:$0xff]   ;;  %v2491_v38 = vld [vmem:[#allocation5 + $0x5e4] ss:$16 sps:$4 sm:$0xff]  }
  0x60   :  { %1384 = vmatpush2.bf16.msra.mxu1 %v2403_v43  ;;  %1342 = vmatprep.subr.bf16.mxu0 %v2404_v44  ;;  %v2489_v40 = vld [vmem:[#allocation5 + $0x5e0] ss:$16 sps:$4 sm:$0xff]   ;;  %v2497_v42 = vld [vmem:[#allocation5 + $0x5c4] ss:$16 sps:$4 sm:$0xff]   ;;  %v2492_v43 = vld [vmem:[#allocation5 + $0x8] ss:$16 sps:$4 sm:$0xff]  }
  0x61   :  { %1385 = vmatprep.subr.bf16.mxu1 %v2406_v45  ;;  %v2495_v44 = vld [vmem:[#allocation5 + $0x5c0] ss:$16 sps:$4 sm:$0xff]   ;;  %v2500_v45 = vld [vmem:[#allocation5 + $0x1ec] ss:$16 sps:$4 sm:$0xff]  }
  0x63   :  { %1343 = vmatpush2.bf16.msra.mxu0 %v2408_v46  ;;  %v2503_v46 = vld [vmem:[#allocation5 + $0x5a4] ss:$16 sps:$4 sm:$0xff]  }
  0x64   :  { %1386 = vmatpush2.bf16.msra.mxu1 %v2409_v47  ;;  %1344 = vmatprep.subr.bf16.mxu0 %v2410_v48  ;;  %v2498_v47 = vld [vmem:[#allocation5 + $0x1e8] ss:$16 sps:$4 sm:$0xff]   ;;  %v2501_v48 = vld [vmem:[#allocation5 + $0x5a0] ss:$16 sps:$4 sm:$0xff]  }
  0x65   :  { %1387 = vmatprep.subr.bf16.mxu1 %v2412_v50  ;;  %v2509_v50 = vld [vmem:[#allocation5 + $0x584] ss:$16 sps:$4 sm:$0xff]  }
  0x67   :  { %1345 = vmatpush2.bf16.msra.mxu0 %v2414_v52  ;;  %v2504_v52 = vld [vmem:[#allocation5 + $0x1c8] ss:$16 sps:$4 sm:$0xff]  }
  0x68   :  { %1388 = vmatpush2.bf16.msra.mxu1 %v2415_v53  ;;  %1346 = vmatprep.subr.bf16.mxu0 %v2416_v54  ;;  %v2507_v53 = vld [vmem:[#allocation5 + $0x580] ss:$16 sps:$4 sm:$0xff]   ;;  %v2512_v54 = vld [vmem:[#allocation5 + $0x1ac] ss:$16 sps:$4 sm:$0xff]  }
  0x69   :  { %1389 = vmatprep.subr.bf16.mxu1 %v2418_v55  ;;  %v2515_v55 = vld [vmem:[#allocation5 + $0x564] ss:$16 sps:$4 sm:$0xff]  }
  0x6b   :  { %1347 = vmatpush2.bf16.msra.mxu0 %v2420_v56  ;;  %v2510_v56 = vld [vmem:[#allocation5 + $0x1a8] ss:$16 sps:$4 sm:$0xff]  }
  0x6c   :  { %1390 = vmatpush2.bf16.msra.mxu1 %v2421_v57  ;;  %1348 = vmatprep.subr.bf16.mxu0 %v2422_v58  ;;  %v2513_v57 = vld [vmem:[#allocation5 + $0x560] ss:$16 sps:$4 sm:$0xff]   ;;  %v2518_v58 = vld [vmem:[#allocation5 + $0x18c] ss:$16 sps:$4 sm:$0xff]  }
  0x6d   :  { %1391 = vmatprep.subr.bf16.mxu1 %v2424_v59  ;;  %v2521_v59 = vld [vmem:[#allocation5 + $0x544] ss:$16 sps:$4 sm:$0xff]  }
  0x6f   :  { %1349 = vmatpush2.bf16.msra.mxu0 %v2426_v60  ;;  %v2516_v60 = vld [vmem:[#allocation5 + $0x188] ss:$16 sps:$4 sm:$0xff]  }
  0x70   :  { %1392 = vmatpush2.bf16.msra.mxu1 %v2427_v61  ;;  %1350 = vmatprep.subr.bf16.mxu0 %v2428_v62  ;;  %v2519_v61 = vld [vmem:[#allocation5 + $0x540] ss:$16 sps:$4 sm:$0xff]   ;;  %v2524_v62 = vld [vmem:[#allocation5 + $0x16c] ss:$16 sps:$4 sm:$0xff]  }
  0x71   :  { %1393 = vmatprep.subr.bf16.mxu1 %v2430_v63  ;;  %v2527_v63 = vld [vmem:[#allocation5 + $0x524] ss:$16 sps:$4 sm:$0xff]  }
  0x73   :  { %1351 = vmatpush2.bf16.msra.mxu0 %v2432_v0  ;;  %v2522_v0 = vld [vmem:[#allocation5 + $0x168] ss:$16 sps:$4 sm:$0xff]  }
  0x74   :  { %1394 = vmatpush2.bf16.msra.mxu1 %v2433_v1  ;;  %1406 = vmatprep.subr.bf16.mxu0 %v2442_v2  ;;  %v2525_v1 = vld [vmem:[#allocation5 + $0x520] ss:$16 sps:$4 sm:$0xff]   ;;  %v2530_v2 = vld [vmem:[#allocation5 + $0x14c] ss:$16 sps:$4 sm:$0xff]  }
  0x75   :  { %1463 = vmatprep.subr.bf16.mxu1 %v2445_v3  ;;  %v2533_v3 = vld [vmem:[#allocation5 + $0x504] ss:$16 sps:$4 sm:$0xff]  }
  0x76   :  { %1353 = vmatmul.mubr.bf16.vlgmr.msra.gmra.mxu0 %v2844_v4 }
  0x77   :  { %1396 = vmatmul.mubr.bf16.vlgmr.msra.gmra.mxu1 %v2846_v5  ;;  %1407 = vmatpush1.bf16.msra.mxu0 %v2440_v6  ;;  %v2528_v6 = vld [vmem:[#allocation5 + $0x148] ss:$16 sps:$4 sm:$0xff]  }
  0x78   :  { %1464 = vmatpush1.bf16.msra.mxu1 %v2443_v7  ;;  %1408 = vmatprep.subr.bf16.mxu0 %v2448_v8  ;;  %v2531_v7 = vld [vmem:[#allocation5 + $0x500] ss:$16 sps:$4 sm:$0xff]   ;;  %v2539_v8 = vld [vmem:[#allocation5 + $0x12c] ss:$16 sps:$4 sm:$0xff]  }
  0x79   :  { %1481 = vmatprep.mubr.bf16.mxu1 %v2792_v11  ;;  %1492 = vmatprep.subr.bf16.mxu1 %v2451_v9  ;;  %v2542_v9 = vld [vmem:[#allocation5 + $0x2ec] ss:$16 sps:$4 sm:$0xff]  }
  0x7a   :  { %1438 = vmatprep.mubr.bf16.mxu0 %v2856_v33 }
  0x7b   :  { %1409 = vmatpush1.bf16.msra.mxu0 %v2446_v10  ;;  %v2859_v10 = vld [vmem:[#allocation2 + $0x10] ss:$28 sps:$4 sm:$0xff]  }
  0x7c   :  { %1410 = vmatprep.subr.bf16.mxu0 %v2454_v12  ;;  %v2537_v12 = vld [vmem:[#allocation5 + $0x128] ss:$16 sps:$4 sm:$0xff]  }
  0x7f   :  { %2245 = vmatmul.mubr.msk.bf16.vlgmr.msra.gmra.mxu1 %vm1316_vm0, %v2851_v14  ;;  %1411 = vmatpush1.bf16.msra.mxu0 %v2452_v15  ;;  %v2545_v15 = vld [vmem:[#allocation5 + $0x10c] ss:$16 sps:$4 sm:$0xff]  }
  0x80   :  { %1493 = vmatpush1.bf16.msra.mxu1 %v2449_v13  ;;  %1412 = vmatprep.subr.bf16.mxu0 %v2461_v17  ;;  %v2540_v13 = vld [vmem:[#allocation5 + $0x2e8] ss:$16 sps:$4 sm:$0xff]  }
  0x81   :  { %1494 = vmatprep.subr.bf16.mxu1 %v2458_v16  ;;  %1524 = vmatprep.mubr.bf16.mxu1 %v2838_v49  ;;  %v2506_v49 = vld [vmem:[#allocation5 + $0x1cc] ss:$16 sps:$4 sm:$0xff]   ;;  %v2543_v17 = vld [vmem:[#allocation5 + $0x108] ss:$16 sps:$4 sm:$0xff]  }
  0x82   :  { %v2548_v16 = vld [vmem:[#allocation5 + $0x2cc] ss:$16 sps:$4 sm:$0xff]  }
  0x83   :  { %1413 = vmatpush1.bf16.msra.mxu0 %v2459_v19  ;;  %v2551_v19 = vld [vmem:[#allocation5 + $0x4ec] ss:$16 sps:$4 sm:$0xff]  }
  0x84   :  { %1495 = vmatpush1.bf16.msra.mxu1 %v2456_v18  ;;  %1414 = vmatprep.subr.bf16.mxu0 %v2467_v21  ;;  %v2546_v18 = vld [vmem:[#allocation5 + $0x2c8] ss:$16 sps:$4 sm:$0xff]  }
  0x85   :  { %1496 = vmatprep.subr.bf16.mxu1 %v2464_v20  ;;  %v2554_v20 = vld [vmem:[#allocation5 + $0x2ac] ss:$16 sps:$4 sm:$0xff]   ;;  %v2549_v21 = vld [vmem:[#allocation5 + $0x4e8] ss:$16 sps:$4 sm:$0xff]  }
  0x87   :  { %1415 = vmatpush1.bf16.msra.mxu0 %v2465_v23  ;;  %v2557_v23 = vld [vmem:[#allocation5 + $0x4cc] ss:$16 sps:$4 sm:$0xff]  }
  0x88   :  { %1497 = vmatpush1.bf16.msra.mxu1 %v2462_v22  ;;  %1416 = vmatprep.subr.bf16.mxu0 %v2473_v25  ;;  %v2552_v22 = vld [vmem:[#allocation5 + $0x2a8] ss:$16 sps:$4 sm:$0xff]  }
  0x89   :  { %1498 = vmatprep.subr.bf16.mxu1 %v2470_v24  ;;  %v2560_v24 = vld [vmem:[#allocation5 + $0x28c] ss:$16 sps:$4 sm:$0xff]   ;;  %v2555_v25 = vld [vmem:[#allocation5 + $0x4c8] ss:$16 sps:$4 sm:$0xff]  }
  0x8b   :  { %1417 = vmatpush1.bf16.msra.mxu0 %v2471_v27  ;;  %v2563_v27 = vld [vmem:[#allocation5 + $0x4ac] ss:$16 sps:$4 sm:$0xff]  }
  0x8c   :  { %1499 = vmatpush1.bf16.msra.mxu1 %v2468_v26  ;;  %1418 = vmatprep.subr.bf16.mxu0 %v2479_v29  ;;  %v2558_v26 = vld [vmem:[#allocation5 + $0x288] ss:$16 sps:$4 sm:$0xff]  }
  0x8d   :  { %1500 = vmatprep.subr.bf16.mxu1 %v2476_v28  ;;  %v2566_v28 = vld [vmem:[#allocation5 + $0x26c] ss:$16 sps:$4 sm:$0xff]   ;;  %v2561_v29 = vld [vmem:[#allocation5 + $0x4a8] ss:$16 sps:$4 sm:$0xff]  }
  0x8f   :  { %1419 = vmatpush1.bf16.msra.mxu0 %v2477_v31  ;;  %v2572_v31 = vld [vmem:[#allocation5 + $0x24c] ss:$16 sps:$4 sm:$0xff]  }
  0x90   :  { %1501 = vmatpush1.bf16.msra.mxu1 %v2474_v30  ;;  %1420 = vmatprep.subr.bf16.mxu0 %v2485_v34  ;;  %v2564_v30 = vld [vmem:[#allocation5 + $0x268] ss:$16 sps:$4 sm:$0xff]  }
  0x91   :  { %1502 = vmatprep.subr.bf16.mxu1 %v2482_v32  ;;  %v2567_v32 = vld [vmem:[#allocation5 + $0x488] ss:$16 sps:$4 sm:$0xff]  }
  0x92   :  { %v2570_v34 = vld [vmem:[#allocation5 + $0x248] ss:$16 sps:$4 sm:$0xff]  }
  0x93   :  { %1421 = vmatpush1.bf16.msra.mxu0 %v2483_v36  ;;  %v2573_v36 = vld [vmem:[#allocation5 + $0x468] ss:$16 sps:$4 sm:$0xff]  }
  0x94   :  { %1503 = vmatpush1.bf16.msra.mxu1 %v2480_v35  ;;  %1422 = vmatprep.subr.bf16.mxu0 %v2491_v38  ;;  %v2575_v35 = vld [vmem:[#allocation5 + $0x46c] ss:$16 sps:$4 sm:$0xff]  }
  0x95   :  { %1504 = vmatprep.subr.bf16.mxu1 %v2488_v37  ;;  %v2576_v37 = vld [vmem:[#allocation5 + $0x228] ss:$16 sps:$4 sm:$0xff]   ;;  %v2581_v38 = vld [vmem:[#allocation5 + $0x44c] ss:$16 sps:$4 sm:$0xff]  }
  0x97   :  { %1423 = vmatpush2.bf16.msra.mxu0 %v2489_v40  ;;  %v2582_v40 = vld [vmem:[#allocation5 + $0x208] ss:$16 sps:$4 sm:$0xff]  }
  0x98   :  { %1505 = vmatpush1.bf16.msra.mxu1 %v2486_v39  ;;  %1424 = vmatprep.subr.bf16.mxu0 %v2497_v42  ;;  %v2584_v39 = vld [vmem:[#allocation5 + $0x20c] ss:$16 sps:$4 sm:$0xff]  }
  0x99   :  { %1506 = vmatprep.subr.bf16.mxu1 %v2494_v41  ;;  %v2587_v41 = vld [vmem:[#allocation5 + $0x42c] ss:$16 sps:$4 sm:$0xff]  }
  0x9a   :  { %v2590_v42 = vld [vmem:[#allocation5 + $0x3ec] ss:$16 sps:$4 sm:$0xff]  }
  0x9b   :  { %1425 = vmatpush2.bf16.msra.mxu0 %v2495_v44  ;;  %v2588_v44 = vld [vmem:[#allocation5 + $0x3e8] ss:$16 sps:$4 sm:$0xff]  }
  0x9c   :  { %1507 = vmatpush1.bf16.msra.mxu1 %v2492_v43  ;;  %1426 = vmatprep.subr.bf16.mxu0 %v2503_v46  ;;  %v2585_v43 = vld [vmem:[#allocation5 + $0x428] ss:$16 sps:$4 sm:$0xff]   ;;  %v2596_v46 = vld [vmem:[#allocation5 + $0x3cc] ss:$16 sps:$4 sm:$0xff]  }
  0x9d   :  { %1508 = vmatprep.subr.bf16.mxu1 %v2500_v45  ;;  %v2593_v45 = vld [vmem:[#allocation5 + $0x40c] ss:$16 sps:$4 sm:$0xff]  }
  0x9f   :  { %1427 = vmatpush2.bf16.msra.mxu0 %v2501_v48  ;;  %v2594_v48 = vld [vmem:[#allocation5 + $0x3c8] ss:$16 sps:$4 sm:$0xff]  }
  0xa0   :  { %1509 = vmatpush2.bf16.msra.mxu1 %v2498_v47  ;;  %1428 = vmatprep.subr.bf16.mxu0 %v2509_v50  ;;  %v2591_v47 = vld [vmem:[#allocation5 + $0x408] ss:$16 sps:$4 sm:$0xff]   ;;  %v2602_v50 = vld [vmem:[#allocation5 + $0x3ac] ss:$16 sps:$4 sm:$0xff]  }
  0xa1   :  { %1510 = vmatprep.subr.bf16.mxu1 %v2506_v49  ;;  %v2599_v49 = vld [vmem:[#allocation5 + $0x5ec] ss:$16 sps:$4 sm:$0xff]  }
  0xa3   :  { %1429 = vmatpush2.bf16.msra.mxu0 %v2507_v53  ;;  %v2600_v53 = vld [vmem:[#allocation5 + $0x3a8] ss:$16 sps:$4 sm:$0xff]  }
  0xa4   :  { %1511 = vmatpush2.bf16.msra.mxu1 %v2504_v52  ;;  %1430 = vmatprep.subr.bf16.mxu0 %v2515_v55  ;;  %v2597_v52 = vld [vmem:[#allocation5 + $0x5e8] ss:$16 sps:$4 sm:$0xff]   ;;  %v2608_v55 = vld [vmem:[#allocation5 + $0x38c] ss:$16 sps:$4 sm:$0xff]  }
  0xa5   :  { %1512 = vmatprep.subr.bf16.mxu1 %v2512_v54  ;;  %v2605_v54 = vld [vmem:[#allocation5 + $0x5cc] ss:$16 sps:$4 sm:$0xff]  }
  0xa7   :  { %1431 = vmatpush2.bf16.msra.mxu0 %v2513_v57  ;;  %v2606_v57 = vld [vmem:[#allocation5 + $0x388] ss:$16 sps:$4 sm:$0xff]  }
  0xa8   :  { %1513 = vmatpush2.bf16.msra.mxu1 %v2510_v56  ;;  %1432 = vmatprep.subr.bf16.mxu0 %v2521_v59  ;;  %v2603_v56 = vld [vmem:[#allocation5 + $0x5c8] ss:$16 sps:$4 sm:$0xff]   ;;  %v2614_v59 = vld [vmem:[#allocation5 + $0x36c] ss:$16 sps:$4 sm:$0xff]  }
  0xa9   :  { %1514 = vmatprep.subr.bf16.mxu1 %v2518_v58  ;;  %v2611_v58 = vld [vmem:[#allocation5 + $0x5ac] ss:$16 sps:$4 sm:$0xff]  }
  0xab   :  { %1433 = vmatpush2.bf16.msra.mxu0 %v2519_v61  ;;  %v2612_v61 = vld [vmem:[#allocation5 + $0x368] ss:$16 sps:$4 sm:$0xff]  }
  0xac   :  { %1515 = vmatpush2.bf16.msra.mxu1 %v2516_v60  ;;  %1434 = vmatprep.subr.bf16.mxu0 %v2527_v63  ;;  %v2609_v60 = vld [vmem:[#allocation5 + $0x5a8] ss:$16 sps:$4 sm:$0xff]   ;;  %v2620_v63 = vld [vmem:[#allocation5 + $0x34c] ss:$16 sps:$4 sm:$0xff]  }
  0xad   :  { %1516 = vmatprep.subr.bf16.mxu1 %v2524_v62  ;;  %v2617_v62 = vld [vmem:[#allocation5 + $0x58c] ss:$16 sps:$4 sm:$0xff]  }
  0xaf   :  { %1435 = vmatpush2.bf16.msra.mxu0 %v2525_v1  ;;  %v2618_v1 = vld [vmem:[#allocation5 + $0x348] ss:$16 sps:$4 sm:$0xff]  }
  0xb0   :  { %1517 = vmatpush2.bf16.msra.mxu1 %v2522_v0  ;;  %1436 = vmatprep.subr.bf16.mxu0 %v2533_v3  ;;  %v2615_v0 = vld [vmem:[#allocation5 + $0x588] ss:$16 sps:$4 sm:$0xff]   ;;  %v2626_v3 = vld [vmem:[#allocation5 + $0x32c] ss:$16 sps:$4 sm:$0xff]  }
  0xb1   :  { %1518 = vmatprep.subr.bf16.mxu1 %v2530_v2  ;;  %v2623_v2 = vld [vmem:[#allocation5 + $0x56c] ss:$16 sps:$4 sm:$0xff]  }
  0xb3   :  { %1437 = vmatpush2.bf16.msra.mxu0 %v2531_v7  ;;  %v2624_v7 = vld [vmem:[#allocation5 + $0x328] ss:$16 sps:$4 sm:$0xff]  }
  0xb4   :  { %1519 = vmatpush2.bf16.msra.mxu1 %v2528_v6  ;;  %1535 = vmatprep.subr.bf16.mxu0 %v2542_v9  ;;  %v2621_v6 = vld [vmem:[#allocation5 + $0x568] ss:$16 sps:$4 sm:$0xff]   ;;  %v2632_v9 = vld [vmem:[#allocation5 + $0x30c] ss:$16 sps:$4 sm:$0xff]  }
  0xb5   :  { %1520 = vmatprep.subr.bf16.mxu1 %v2539_v8  ;;  %v2629_v8 = vld [vmem:[#allocation5 + $0x54c] ss:$16 sps:$4 sm:$0xff]  }
  0xb6   :  { %1439 = vmatmul.mubr.bf16.vlgmr.msra.gmra.mxu0 %v2859_v10 }
  0xb7   :  { %1536 = vmatpush1.bf16.msra.mxu0 %v2540_v13  ;;  %1567 = vmatprep.mubr.bf16.mxu0 %v2840_v51  ;;  %v2569_v51 = vld [vmem:[#allocation5 + $0x48c] ss:$16 sps:$4 sm:$0xff]   ;;  %v2630_v13 = vld [vmem:[#allocation5 + $0x308] ss:$16 sps:$4 sm:$0xff]  }
  0xb8   :  { %1521 = vmatpush2.bf16.msra.mxu1 %v2537_v12  ;;  %1537 = vmatprep.subr.bf16.mxu0 %v2548_v16  ;;  %v2627_v12 = vld [vmem:[#allocation5 + $0x548] ss:$16 sps:$4 sm:$0xff]   ;;  %v2638_v16 = vld [vmem:[#allocation5 + $0x60c] ss:$16 sps:$4 sm:$0xff]  }
  0xb9   :  { %1522 = vmatprep.subr.bf16.mxu1 %v2545_v15  ;;  %v2635_v15 = vld [vmem:[#allocation5 + $0x52c] ss:$16 sps:$4 sm:$0xff]  }
  0xbb   :  { %1538 = vmatpush1.bf16.msra.mxu0 %v2546_v18  ;;  %v2636_v18 = vld [vmem:[#allocation5 + $0x608] ss:$16 sps:$4 sm:$0xff]  }
  0xbc   :  { %1523 = vmatpush2.bf16.msra.mxu1 %v2543_v17  ;;  %1539 = vmatprep.subr.bf16.mxu0 %v2554_v20  ;;  %v2633_v17 = vld [vmem:[#allocation5 + $0x528] ss:$16 sps:$4 sm:$0xff]   ;;  %v2642_v20 = vld [vmem:[#allocation8 + $0x78] sm:$0xff]  }
  0xbd   :  { %1578 = vmatprep.subr.bf16.mxu1 %v2551_v19  ;;  %v2641_v19 = vld [vmem:[#allocation5 + $0x50c] ss:$16 sps:$4 sm:$0xff]  }
  0xbf   :  { %1525 = vmatmul.mubr.bf16.vlgmr.msra.gmra.mxu1 %v2844_v4  ;;  %1540 = vmatpush1.bf16.msra.mxu0 %v2552_v22  ;;  %v2578_v4 = vld [vmem:[#allocation5 + $0x22c] ss:$16 sps:$4 sm:$0xff]  }
  0xc0   :  { %1579 = vmatpush1.bf16.msra.mxu1 %v2549_v21  ;;  %1541 = vmatprep.subr.bf16.mxu0 %v2560_v24  ;;  %v2639_v21 = vld [vmem:[#allocation5 + $0x508] ss:$16 sps:$4 sm:$0xff]   ;;  %v2643_v22 = vld [vmem:[#allocation8 + $0x38] sm:$0xff]  }
  0xc1   :  { %1580 = vmatprep.subr.bf16.mxu1 %v2557_v23  ;;  %1610 = vmatprep.mubr.bf16.mxu1 %v2856_v33  ;;  %v2579_v33 = vld [vmem:[#allocation5 + $0x448] ss:$16 sps:$4 sm:$0xff]  }
  0xc2   :  { %v2644_v23 = vld [vmem:[#allocation8 + $0x70] sm:$0xff]  }
  0xc3   :  { %1542 = vmatpush1.bf16.msra.mxu0 %v2558_v26  ;;  %v2645_v24 = vld [vmem:[#allocation8 + $0x30] sm:$0xff]   ;;  %v2648_v26 = vld [vmem:[#allocation8 + $0x60] sm:$0xff]  }
  0xc4   :  { %1581 = vmatpush1.bf16.msra.mxu1 %v2555_v25  ;;  %1543 = vmatprep.subr.bf16.mxu0 %v2566_v28  ;;  %v2646_v25 = vld [vmem:[#allocation8 + $0x68] sm:$0xff]   ;;  %v2659_v28 = vld [vmem:[#allocation8 + $0xb8] sm:$0xff]  }
  0xc5   :  { %1582 = vmatprep.subr.bf16.mxu1 %v2563_v27  ;;  %v2658_v27 = vld [vmem:[#allocation8 + $0xf8] sm:$0xff]  }
  0xc7   :  { %1544 = vmatpush1.bf16.msra.mxu0 %v2564_v30  ;;  %v2650_v30 = vld [vmem:[#allocation8 + $0x58] sm:$0xff]  }
  0xc8   :  { %1583 = vmatpush1.bf16.msra.mxu1 %v2561_v29  ;;  %1545 = vmatprep.subr.bf16.mxu0 %v2572_v31  ;;  %v2649_v29 = vld [vmem:[#allocation8 + $0x20] sm:$0xff]   ;;  %v2652_v31 = vld [vmem:[#allocation8 + $0x50] sm:$0xff]  }
  0xc9   :  { %1584 = vmatprep.subr.bf16.mxu1 %v2569_v51  ;;  %v2651_v51 = vld [vmem:[#allocation8 + $0x18] sm:$0xff]  }
  0xcb   :  { %1546 = vmatpush1.bf16.msra.mxu0 %v2570_v34  ;;  %v2654_v34 = vld [vmem:[#allocation8 + $0x48] sm:$0xff]  }
  0xcc   :  { %1585 = vmatpush1.bf16.msra.mxu1 %v2567_v32  ;;  %1547 = vmatprep.subr.bf16.mxu0 %v2578_v4  ;;  %v2653_v32 = vld [vmem:[#allocation8 + $0x10] sm:$0xff]   ;;  %v2656_v4 = vld [vmem:[#allocation8 + $0x40] sm:$0xff]  }
  0xcd   :  { %1586 = vmatprep.subr.bf16.mxu1 %v2575_v35  ;;  %v2655_v35 = vld [vmem:[#allocation8 + $0x8] sm:$0xff]  }
  0xcf   :  { %1548 = vmatpush1.bf16.msra.mxu0 %v2576_v37  ;;  %v2663_v37 = vld [vmem:[#allocation8 + $0xa8] sm:$0xff]  }
  0xd0   :  { %1587 = vmatpush1.bf16.msra.mxu1 %v2573_v36  ;;  %1549 = vmatprep.subr.bf16.mxu0 %v2584_v39  ;;  %v2657_v36 = vld [vmem:[#allocation8] sm:$0xff]  }
  0xd1   :  { %1588 = vmatprep.subr.bf16.mxu1 %v2581_v38  ;;  %v2664_v38 = vld [vmem:[#allocation8 + $0xe0] sm:$0xff]  }
  0xd2   :  { %v2665_v39 = vld [vmem:[#allocation8 + $0xa0] sm:$0xff]  }
  0xd3   :  { %1550 = vmatpush1.bf16.msra.mxu0 %v2582_v40  ;;  %v2667_v40 = vld [vmem:[#allocation8 + $0x98] sm:$0xff]  }
  0xd4   :  { %1589 = vmatpush1.bf16.msra.mxu1 %v2579_v33  ;;  %1551 = vmatprep.subr.bf16.mxu0 %v2590_v42  ;;  %v2666_v33 = vld [vmem:[#allocation8 + $0xd8] sm:$0xff]   ;;  %v2669_v42 = vld [vmem:[#allocation8 + $0x90] sm:$0xff]  }
  0xd5   :  { %1590 = vmatprep.subr.bf16.mxu1 %v2587_v41  ;;  %v2668_v41 = vld [vmem:[#allocation8 + $0xd0] sm:$0xff]  }
  0xd7   :  { %1552 = vmatpush2.bf16.msra.mxu0 %v2588_v44  ;;  %v2671_v44 = vld [vmem:[#allocation8 + $0x88] sm:$0xff]  }
  0xd8   :  { %1591 = vmatpush1.bf16.msra.mxu1 %v2585_v43  ;;  %1553 = vmatprep.subr.bf16.mxu0 %v2596_v46  ;;  %v2670_v43 = vld [vmem:[#allocation8 + $0xc8] sm:$0xff]   ;;  %v2673_v46 = vld [vmem:[#allocation8 + $0x80] sm:$0xff]  }
  0xd9   :  { %1592 = vmatprep.subr.bf16.mxu1 %v2593_v45  ;;  %v2672_v45 = vld [vmem:[#allocation8 + $0xc0] sm:$0xff]  }
  0xdb   :  { %1554 = vmatpush2.bf16.msra.mxu0 %v2594_v48  ;;  %v281_v48 = vlaneseq }
  0xdc   :  { %1593 = vmatpush1.bf16.msra.mxu1 %v2591_v47  ;;  %1555 = vmatprep.subr.bf16.mxu0 %v2602_v50 }
  0xdd   :  { %1594 = vmatprep.subr.bf16.mxu1 %v2599_v49  ;;  %v282_v50 = vshrl.u32 %v281_v48, 7 }
  0xdf   :  { %1556 = vmatpush2.bf16.msra.mxu0 %v2600_v53 }
  0xe0   :  { %1595 = vmatpush2.bf16.msra.mxu1 %v2597_v52  ;;  %1557 = vmatprep.subr.bf16.mxu0 %v2608_v55  ;;  %v283_v55 = vsub.s32 0, %v282_v50 }
  0xe1   :  { %1596 = vmatprep.subr.bf16.mxu1 %v2605_v54  ;;  %v287_v54 = vsub.s32 1, %v282_v50 }
  0xe3   :  { %1558 = vmatpush2.bf16.msra.mxu0 %v2606_v57  ;;  %v279_v57 = vld [vmem:[#allocation7] sm:$0xf] }
  0xe4   :  { %1597 = vmatpush2.bf16.msra.mxu1 %v2603_v56  ;;  %1559 = vmatprep.subr.bf16.mxu0 %v2614_v59  ;;  %v288_v59 = vrot.slane %v279_v57, %v287_v54 }
  0xe5   :  { %1598 = vmatprep.subr.bf16.mxu1 %v2611_v58 }
  0xe7   :  { %1560 = vmatpush2.bf16.msra.mxu0 %v2612_v61 }
  0xe8   :  { %1599 = vmatpush2.bf16.msra.mxu1 %v2609_v60  ;;  %1561 = vmatprep.subr.bf16.mxu0 %v2620_v63  ;;  %v284_v60 = vrot.slane %v279_v57, %v283_v55 }
  0xe9   :  { %1600 = vmatprep.subr.bf16.mxu1 %v2617_v62 }
  0xeb   :  { %1562 = vmatpush2.bf16.msra.mxu0 %v2618_v1 }
  0xec   :  { %1601 = vmatpush2.bf16.msra.mxu1 %v2615_v0  ;;  %1563 = vmatprep.subr.bf16.mxu0 %v2626_v3 }
  0xed   :  { %1602 = vmatprep.subr.bf16.mxu1 %v2623_v2 }
  0xef   :  { %1564 = vmatpush2.bf16.msra.mxu0 %v2624_v7 }
  0xf0   :  { %1603 = vmatpush2.bf16.msra.mxu1 %v2621_v6  ;;  %1565 = vmatprep.subr.bf16.mxu0 %v2632_v9 }
  0xf1   :  { %1604 = vmatprep.subr.bf16.mxu1 %v2629_v8 }
  0xf3   :  { %1566 = vmatpush2.bf16.msra.mxu0 %v2630_v13 }
  0xf4   :  { %1605 = vmatpush2.bf16.msra.mxu1 %v2627_v12  ;;  %1635 = vmatprep.subr.bf16.mxu0 %v2638_v16 }
  0xf5   :  { %1606 = vmatprep.subr.bf16.mxu1 %v2635_v15 }
  0xf6   :  { %1568 = vmatmul.mubr.bf16.vlgmr.msra.gmra.mxu0 %v2846_v5  ;;  %v2647_v5 = vld [vmem:[#allocation8 + $0x28] sm:$0xff]  }
  0xf7   :  { %1636 = vmatpush1.bf16.msra.mxu0 %v2636_v18  ;;  %1653 = vmatprep.mubr.bf16.mxu0 %v2792_v11  ;;  %v2660_v11 = vld [vmem:[#allocation8 + $0xf0] sm:$0xff]  }
  0xf8   :  { %1607 = vmatpush2.bf16.msra.mxu1 %v2633_v17  ;;  %2280 = vmatprep.subr.bf16.mxu0 %v2642_v20 }
  0xf9   :  { %1608 = vmatprep.subr.bf16.mxu1 %v2641_v19 }
  0xfc   :  { %1609 = vmatpush2.bf16.msra.mxu1 %v2639_v21 }
  0xfd   :  { %2302 = vmatprep.subr.bf16.mxu1 %v2658_v27 }
  0xfe   :  { %2246 = vmatmul.mubr.msk.bf16.vlgmr.msra.gmra.mxu0 %vm1316_vm0, %v2851_v14  ;;  %v2662_v14 = vld [vmem:[#allocation8 + $0xe8] sm:$0xff]  }
  0xff   :  { %1611 = vmatmul.mubr.bf16.vlgmr.msra.gmra.mxu1 %v2859_v10  ;;  %2281 = vmatpush3.bf16.msra.mxu0 %v2643_v22  ;;  %v2661_v10 = vld [vmem:[#allocation8 + $0xb0] sm:$0xff]  }
 0x100   :  { %2282 = vmatprep.subr.bf16.mxu0 %v2644_v23  ;;  %2303 = vmatpush3.bf16.msra.mxu1 %v2659_v28 }
 0x101   :  { %2304 = vmatprep.subr.bf16.mxu1 %v2660_v11 }
 0x103   :  { %2283 = vmatpush3.bf16.msra.mxu0 %v2645_v24 }
 0x104   :  { %2284 = vmatprep.subr.bf16.mxu0 %v2646_v25  ;;  %2305 = vmatpush3.bf16.msra.mxu1 %v2661_v10 }
 0x105   :  { %2306 = vmatprep.subr.bf16.mxu1 %v2662_v14 }
 0x107   :  { %2285 = vmatpush3.bf16.msra.mxu0 %v2647_v5 }
 0x108   :  { %2286 = vmatprep.subr.bf16.mxu0 %v2648_v26  ;;  %2307 = vmatpush3.bf16.msra.mxu1 %v2663_v37 }
 0x109   :  { %2308 = vmatprep.subr.bf16.mxu1 %v2664_v38 }
 0x10b   :  { %2287 = vmatpush3.bf16.msra.mxu0 %v2649_v29 }
 0x10c   :  { %2288 = vmatprep.subr.bf16.mxu0 %v2650_v30  ;;  %2309 = vmatpush3.bf16.msra.mxu1 %v2665_v39 }
 0x10d   :  { %2310 = vmatprep.subr.bf16.mxu1 %v2666_v33 }
 0x10f   :  { %2289 = vmatpush3.bf16.msra.mxu0 %v2651_v51 }
 0x110   :  { %2290 = vmatprep.subr.bf16.mxu0 %v2652_v31  ;;  %2311 = vmatpush3.bf16.msra.mxu1 %v2667_v40  ;;  %v295_v31 = vsub.s32 3, %v282_v50 }
 0x111   :  { %2312 = vmatprep.subr.bf16.mxu1 %v2668_v41 }
 0x113   :  { %2291 = vmatpush3.bf16.msra.mxu0 %v2653_v32  ;;  %v291_v32 = vsub.s32 2, %v282_v50 }
 0x114   :  { %2292 = vmatprep.subr.bf16.mxu0 %v2654_v34  ;;  %2313 = vmatpush3.bf16.msra.mxu1 %v2669_v42 }
 0x115   :  { %2314 = vmatprep.subr.bf16.mxu1 %v2670_v43  ;;  %v292_v37 = vrot.slane %v279_v57, %v291_v32 }
 0x117   :  { %2293 = vmatpush3.bf16.msra.mxu0 %v2655_v35 }
 0x118   :  { %2294 = vmatprep.subr.bf16.mxu0 %v2656_v4  ;;  %2315 = vmatpush3.bf16.msra.mxu1 %v2671_v44 }
 0x119   :  { %2316 = vmatprep.subr.bf16.mxu1 %v2672_v45 }
 0x11b   :  { %2295 = vmatpush3.bf16.msra.mxu0 %v2657_v36  ;;  %v296_v36 = vrot.slane %v279_v57, %v295_v31 }
 0x11c   :  { %2317 = vmatpush3.bf16.msra.mxu1 %v2673_v46 }
 0x136   :  { %v1354_v52 = vpop.f32.mrf.mxu0 }
 0x137   :  { %v1397_v47 = vpop.f32.mrf.mxu1  ;;  %v1355_v0 = vadd.f32 %v1354_v52, %v284_v60 }
 0x138   :  { %v1356_v56 = vpop.f32.mrf.mxu0 }
 0x139   :  { %v1399_v49 = vpop.f32.mrf.mxu1  ;;  %v1357_v63 = vadd.f32 %v1356_v56, %v288_v59  ;;  %v1398_v9 = vadd.f32 %v1397_v47, %v1355_v0 }
 0x13a   :  { %v1358_v61 = vpop.f32.mrf.mxu0 }
 0x13b   :  { %v1401_v53 = vpop.f32.mrf.mxu1  ;;  %v1359_v2 = vadd.f32 %v1358_v61, %v284_v60  ;;  %v1400_v7 = vadd.f32 %v1399_v49, %v1357_v63 }
 0x13c   :  { %v1360_v1 = vpop.f32.mrf.mxu0 }
 0x13d   :  { %v1403_v58 = vpop.f32.mrf.mxu1  ;;  %v1361_v8 = vadd.f32 %v1360_v1, %v288_v59  ;;  %v1402_v13 = vadd.f32 %v1401_v53, %v1359_v2 }
 0x13f   :  { %v1483_v62 = vpop.f32.mrf.mxu1  ;;  %v1404_v19 = vadd.f32 %v1403_v58, %v1361_v8 }
 0x141   :  { %v1485_v3 = vpop.f32.mrf.mxu1 }
 0x143   :  { %v1487_v16 = vpop.f32.mrf.mxu1 }
 0x145   :  { %v1489_v25 = vpop.f32.mrf.mxu1 }
 0x176   :  { %v1440_v6 = vpop.f32.mrf.mxu0 }
 0x177   :  { %v1441_v17 = vadd.f32 %v1440_v6, %v1398_v9 }
 0x178   :  { %v1442_v12 = vpop.f32.mrf.mxu0 }
 0x179   :  { %v1443_v15 = vadd.f32 %v1442_v12, %v1400_v7  ;;  %v1484_v5 = vadd.f32 %v1483_v62, %v1441_v17 }
 0x17a   :  { %v1444_v18 = vpop.f32.mrf.mxu0 }
 0x17b   :  { %v1445_v20 = vadd.f32 %v1444_v18, %v1402_v13  ;;  %v1486_v22 = vadd.f32 %v1485_v3, %v1443_v15  ;;  %v1664_v29 = vmax.f32 %v1484_v5, 0.0 }
 0x17c   :  { %v1446_v21 = vpop.f32.mrf.mxu0 }
 0x17d   :  { %v1488_v23 = vadd.f32 %v1487_v16, %v1445_v20  ;;  %v1447_v24 = vadd.f32 %v1446_v21, %v1404_v19  ;;  %v1665_v28 = vmax.f32 %v1486_v22, 0.0  ;;  %v2247_v16 = vld [vmem:[%s2880_s4] ss:$0 sm:$0xff] }
 0x17f   :  { %v1490_v26 = vadd.f32 %v1489_v25, %v1447_v24  ;;  %v1668_v27 = vmax.f32 %v1488_v23, 0.0  ;;  %v1526_v14 = vpop.f32.mrf.mxu1 }
 0x180   :  { %v1527_v41 = vadd.f32 %v1526_v14, %v292_v37 }
 0x181   :  { %v1669_v11 = vmax.f32 %v1490_v26, 0.0  ;;  %v1672_v10 = vpack.c.bf16 %v1668_v27, %v1664_v29  ;;  %v1528_v51 = vpop.f32.mrf.mxu1 }
 0x182   :  { %v1529_v40 = vadd.f32 %v1528_v51, %v296_v36 }
 0x183   :  { %v1673_v30 = vpack.c.bf16 %v1669_v11, %v1665_v28  ;;  %v1530_v35 = vpop.f32.mrf.mxu1 }
 0x184   :  { %v1531_v44 = vadd.f32 %v1530_v35, %v292_v37 }
 0x185   :  { %1971 = vmatprep.mubr.bf16.mxu0 %v1673_v30  ;;  %v1532_v39 = vpop.f32.mrf.mxu1 }
 0x186   :  { %1972 = vmatmul.mubr.bf16.vlgmr.msra.gmra.mxu0 %v1672_v10  ;;  %v1533_v49 = vadd.f32 %v1532_v39, %v296_v36 }
 0x1b6   :  { %v1569_v34 = vpop.f32.mrf.mxu0 }
 0x1b7   :  { %v1570_v46 = vadd.f32 %v1569_v34, %v1527_v41 }
 0x1b8   :  { %v1571_v4 = vpop.f32.mrf.mxu0 }
 0x1b9   :  { %v1572_v45 = vadd.f32 %v1571_v4, %v1529_v40 }
 0x1ba   :  { %v1573_v38 = vpop.f32.mrf.mxu0 }
 0x1bb   :  { %v1574_v52 = vadd.f32 %v1573_v38, %v1531_v44 }
 0x1bc   :  { %v1575_v33 = vpop.f32.mrf.mxu0 }
 0x1bd   :  { %v1576_v56 = vadd.f32 %v1575_v33, %v1533_v49 }
 0x1be   :  { %v1655_v43 = vpop.f32.mrf.mxu0 }
 0x1bf   :  { %v1612_v42 = vpop.f32.mrf.mxu1 }
 0x1c0   :  { %v1657_v48 = vpop.f32.mrf.mxu0  ;;  %v1613_v53 = vadd.f32 %v1612_v42, %v1570_v46 }
 0x1c1   :  { %v1614_v47 = vpop.f32.mrf.mxu1 }
 0x1c2   :  { %v1615_v50 = vadd.f32 %v1614_v47, %v1572_v45  ;;  %v1659_v55 = vpop.f32.mrf.mxu0  ;;  %v1656_v63 = vadd.f32 %v1655_v43, %v1613_v53 }
 0x1c3   :  { %v1616_v54 = vpop.f32.mrf.mxu1 }
 0x1c4   :  { %v1617_v57 = vadd.f32 %v1616_v54, %v1574_v52  ;;  %v1661_v59 = vpop.f32.mrf.mxu0  ;;  %v1658_v60 = vadd.f32 %v1657_v48, %v1615_v50  ;;  %v1666_v6 = vmax.f32 %v1656_v63, 0.0 }
 0x1c5   :  { %v1618_v58 = vpop.f32.mrf.mxu1 }
 0x1c6   :  { %v1660_v61 = vadd.f32 %v1659_v55, %v1617_v57  ;;  %v1619_v62 = vadd.f32 %v1618_v58, %v1576_v56  ;;  %v1667_v2 = vmax.f32 %v1658_v60, 0.0 }
 0x1c8   :  { %v1662_v0 = vadd.f32 %v1661_v59, %v1619_v62  ;;  %v1670_v1 = vmax.f32 %v1660_v61, 0.0 }
 0x1ca   :  { %v1671_v3 = vmax.f32 %v1662_v0, 0.0  ;;  %v1674_v8 = vpack.c.bf16 %v1670_v1, %v1666_v6 }
 0x1cc   :  { %v1675_v7 = vpack.c.bf16 %v1671_v3, %v1667_v2 }
 0x1ce   :  { %2012 = vmatprep.mubr.bf16.mxu1 %v1675_v7 }
 0x1cf   :  { %2013 = vmatmul.mubr.bf16.vlgmr.msra.gmra.mxu1 %v1674_v8 }
 0x246   :  { %v2296_v9 = vpop.f32.mrf.mxu0 }
 0x248   :  { %v2297_v12 = vpop.f32.mrf.mxu0 }
 0x249   :  { %v2298_v15 = vadd.f32 %v2297_v12, %v2296_v9 }
 0x24a   :  { %v2299_v13 = vpop.f32.mrf.mxu0 }
 0x24b   :  { %v1974_v20 = vadd.f32 %v2298_v15, %v2247_v16 }
 0x24c   :  { %v2300_v17 = vpop.f32.mrf.mxu0 }
 0x24d   :  { %v2301_v21 = vadd.f32 %v2300_v17, %v2299_v13 }
 0x24f   :  { %v1977_v5 = vadd.f32 %v2301_v21, %v2247_v16 }
 0x28f   :  { %v2318_v18 = vpop.f32.mrf.mxu1 }
 0x291   :  { %v2319_v19 = vpop.f32.mrf.mxu1 }
 0x292   :  { %v2320_v22 = vadd.f32 %v2319_v19, %v2318_v18 }
 0x293   :  { %v2321_v23 = vpop.f32.mrf.mxu1 }
 0x294   :  { %v2015_v24 = vadd.f32 %v2320_v22, %v1974_v20 }
 0x295   :  { %v2322_v25 = vpop.f32.mrf.mxu1 }
 0x296   :  { %2021 = vst [vmem:[#allocation10] sm:$0xff] %v2015_v24  ;;  %v2323_v26 = vadd.f32 %v2322_v25, %v2321_v23 }
 0x298   :  { %v2018_v27 = vadd.f32 %v2323_v26, %v1977_v5 }
 0x29a   :  { %2022 = vst [vmem:[#allocation10 + $0x8] sm:$0xff] %v2018_v27 }
 0x29b   :  { %2765 = shalt.err (!%p2762_p10)
}
 0x29c   :  { %s2794_s4 = smov 128   ;;  %s2795_s20 = smov 8  }
 0x29d   :  { %2034 = dma.vmem_to_hbm [thread:$0]  %s2029_s18, 256, %s2881_s5, [#allocation4], %s2794_s4, %s2794_s4, %s2795_s20  }
 0x29e   :  { %2780 = dma.done.wait [#allocation4], 256  }
 0x29f   :  { %2781 = vsyncadd [#allocation4], 4294967040 }
 0x2a0   :  { %2038 = vsyncpa [#allocation3], 1 }
 0x2a1   :  { %2039 = vsyncpa [#allocation6], 1 }
 0x2a2   :  { %2040 = vsyncpa [#allocation9], 1 }
 0x2a3   :  { %2041 = vsyncpa [#allocation4], 1 }

</bundles_post_ra>
